<compile_context>
chip_gen: v7x
topology: tpu7x:2x2x1
jax: 0.10.0
libtpu: 0.0.40
codegen_flags: <defaults>
</compile_context>

<pallas_src>
import functools

import jax
import jax.numpy as jnp
import numpy as np
from jax.experimental import pallas as pl
from jax.experimental.pallas import tpu as pltpu


def _confidence_ce_kernel(aw_ref, ast_ref, out_ref, *, threshold,
                          apply_class_balancing):
    # Inputs are (C, B): classes on sublanes, batch on lanes (lane-dense since C << 128).
    c, b = aw_ref.shape
    aw = aw_ref[...].astype(jnp.float32)    # (c, b) weak-augmentation logits
    ast = ast_ref[...].astype(jnp.float32)  # (c, b) strong-augmentation logits

    # ---- weak anchors: max softmax prob == 1 / sum(exp(aw - max)) ----
    m_w = jnp.max(aw, axis=0, keepdims=True)                  # (1, b)
    s_w = jnp.sum(jnp.exp(aw - m_w), axis=0, keepdims=True)   # (1, b)
    max_prob = 1.0 / s_w                                      # exact divide -> exact threshold compare
    mask = max_prob > threshold                               # (1, b) bool
    maskf = mask.astype(jnp.float32)
    n_f = jnp.sum(maskf, keepdims=True)                       # (1, 1) #confident samples

    # ---- pseudo-label: argmax on the raw logits (first-index tie-break, like torch.max) ----
    cls = jax.lax.broadcasted_iota(jnp.int32, (c, b), 0)
    target = jnp.min(jnp.where(aw == m_w, cls, c), axis=0, keepdims=True)  # (1, b) int32
    onehot = (cls == target).astype(jnp.float32)              # (c, b)

    # ---- strong anchors: only log_softmax at the pseudo-label is needed ----
    m_s = jnp.max(ast, axis=0, keepdims=True)                               # (1, b)
    lse = jnp.log(jnp.sum(jnp.exp(ast - m_s), axis=0, keepdims=True))       # (1, b)
    picked = jnp.sum(onehot * ast, axis=0, keepdims=True)                   # (1, b)
    nll = lse - (picked - m_s)                                              # (1, b)

    # ---- class-balancing: weight[k] = n / count_k for classes present under the mask ----
    if apply_class_balancing:
        counts = jnp.sum(onehot * maskf, axis=1, keepdims=True)             # (c, 1)
        weight = jnp.where(counts > 0.0, n_f / counts, 1.0)                 # (c, 1)
        w_i = jnp.sum(onehot * weight, axis=0, keepdims=True)               # (1, b)
    else:
        w_i = jnp.ones((1, b), jnp.float32)

    # ---- weighted masked mean == F.cross_entropy(weight=..., reduction='mean') ----
    contrib = maskf * w_i                                     # (1, b)
    num = jnp.sum(contrib * nll, keepdims=True)               # (1, 1)
    den = jnp.sum(contrib, keepdims=True)                     # (1, 1)
    has_any = den > 0.0
    # Exact divide; guard against an all-zero mask so the jit path never emits NaN.
    loss = jnp.where(has_any, num / jnp.where(has_any, den, 1.0), 0.0)      # (1, 1)

    # ---- pack into one small (8, b) f32 slab: row0 target, row1 mask, row2 loss, row3 n ----
    row = jax.lax.broadcasted_iota(jnp.int32, (8, b), 0)
    packed = jnp.where(row == 0, target.astype(jnp.float32), 0.0)
    packed = jnp.where(row == 1, maskf, packed)
    packed = jnp.where(row == 2, loss, packed)
    packed = jnp.where(row == 3, n_f, packed)
    out_ref[...] = packed


@functools.partial(jax.jit, static_argnames=("threshold", "apply_class_balancing"))
def confidence_based_ce_pallas(anchors_weak, anchors_strong, *, threshold,
                               apply_class_balancing):
    b, c = anchors_weak.shape
    # (C, B) working layout: batch on lanes.  This small XLA transpose replaces the old
    # jnp.stack copy and buys a ~128/C reduction in in-kernel vector-op counts (C << 128).
    aw_t = anchors_weak.T
    ast_t = anchors_strong.T

    kernel = functools.partial(
        _confidence_ce_kernel,
        threshold=float(threshold),
        apply_class_balancing=bool(apply_class_balancing),
    )

    in_bytes = 2 * b * c * 4
    out_bytes = 8 * b * 4
    # Whole problem is one VMEM-resident block; budget with headroom, capped at v7x's
    # 64 MiB physical VMEM (beyond that a B-grid would be required -- see module TODO).
    vmem_limit = int(min(max(32 << 20, 4 * (in_bytes + out_bytes)), 64 << 20))

    packed = pl.pallas_call(
        kernel,
        out_shape=jax.ShapeDtypeStruct((8, b), jnp.float32),
        in_specs=[pl.BlockSpec(memory_space=pltpu.MemorySpace.VMEM),
                  pl.BlockSpec(memory_space=pltpu.MemorySpace.VMEM)],
        out_specs=pl.BlockSpec(memory_space=pltpu.MemorySpace.VMEM),
        compiler_params=pltpu.CompilerParams(vmem_limit_bytes=vmem_limit),
    )(aw_t, ast_t)

    target = packed[0, :].astype(jnp.int32)
    mask = packed[1, :] > 0.5
    loss = packed[2, 0]
    n = packed[3, 0].astype(jnp.int32)
    return loss, target, mask, n


class ConfidenceBasedCEScanPallas:
    """JAX/Pallas port of SCAN's ConfidenceBasedCE_scan forward pass."""

    def __init__(self, ct1, ct2, apply_class_balancing):
        self.ct1 = ct1
        self.ct2 = ct2
        self.threshold = ct2
        self.apply_class_balancing = apply_class_balancing

    def device_forward(self, anchors_weak, anchors_strong):
        """Jit-friendly fast path: device arrays (loss, dense target, dense mask, n)."""
        return confidence_based_ce_pallas(
            anchors_weak, anchors_strong,
            threshold=float(self.threshold),
            apply_class_balancing=bool(self.apply_class_balancing))

    def __call__(self, anchors_weak, anchors_strong, neighbors, labels):
        loss, target, mask, n = self.device_forward(anchors_weak, anchors_strong)
        # TODO(synk): dynamic-shape masked selects (target[mask], labels[mask]) have no
        # jittable/Pallas equivalent; this host round trip exists only to mirror the
        # PyTorch return signature. Use device_forward() inside jitted training steps.
        mask_np = np.asarray(mask)
        if not mask_np.any():
            raise ValueError("Mask in MaskedCrossEntropyLoss is all zeros.")
        target_masked = np.asarray(target)[mask_np]
        labels_masked = np.asarray(labels).reshape(-1)[mask_np]
        return loss, target_masked, labels_masked, int(np.asarray(n))


if __name__ == "__main__":
    key = jax.random.PRNGKey(0)
    k1, k2, k3, k4 = jax.random.split(key, 4)

    B, C = 16, 10  # small SCAN-style batch: 16 samples, 10 clusters
    anchors_weak = 3.0 * jax.random.normal(k1, (B, C), dtype=jnp.float32)
    anchors_strong = 3.0 * jax.random.normal(k2, (B, C), dtype=jnp.float32)
    neighbors = 3.0 * jax.random.normal(k3, (B, C), dtype=jnp.float32)  # unused by forward
    labels = jax.random.randint(k4, (B,), 0, C, dtype=jnp.int32)

    crit = ConfidenceBasedCEScanPallas(ct1=0.2, ct2=0.2, apply_class_balancing=True)

    # Fast, fully-on-device path (no host sync inside).
    loss_d, target_d, mask_d, n_d = crit.device_forward(anchors_weak, anchors_strong)
    jax.block_until_ready((loss_d, target_d, mask_d, n_d))

    # Full PyTorch-parity path (host-side masked selects).
    loss, target_masked, labels_masked, n = crit(anchors_weak, anchors_strong,
                                                 neighbors, labels)

    # ---- pure-numpy reference check ----
    aw = np.asarray(anchors_weak, dtype=np.float32)
    ast = np.asarray(anchors_strong, dtype=np.float32)
    p = np.exp(aw - aw.max(axis=1, keepdims=True))
    p /= p.sum(axis=1, keepdims=True)
    tgt_ref = p.argmax(axis=1)
    mask_ref = p.max(axis=1) > crit.threshold
    n_ref = int(mask_ref.sum())
    lp = ast - ast.max(axis=1, keepdims=True)
    lp = lp - np.log(np.exp(lp).sum(axis=1, keepdims=True))
    nll_ref = -lp[np.arange(B), tgt_ref]
    counts = np.bincount(tgt_ref[mask_ref], minlength=C).astype(np.float32)
    weight = np.where(counts > 0, n_ref / np.maximum(counts, 1.0), 1.0)
    w_ref = weight[tgt_ref]
    loss_ref = float((mask_ref * w_ref * nll_ref).sum() / (mask_ref * w_ref).sum())

    loss_val = float(np.asarray(loss))
    assert np.isfinite(loss_val)
    assert n == n_ref, (n, n_ref)
    assert np.array_equal(np.asarray(target_d), tgt_ref.astype(np.int32))
    assert np.array_equal(np.asarray(mask_d), mask_ref)
    assert abs(loss_val - loss_ref) <= 1e-3 * max(1.0, abs(loss_ref)), (loss_val, loss_ref)
    assert target_masked.shape[0] == n and labels_masked.shape[0] == n

    print("KERNEL_OK")
</pallas_src>

<mosaic_0001>
module attributes {stable_mosaic.version = 11 : i64} {
  func.func @_confidence_ce_kernel(%arg0: memref<10x16xf32, #tpu.memory_space<vmem>>, %arg1: memref<10x16xf32, #tpu.memory_space<vmem>>, %arg2: memref<8x16xf32, #tpu.memory_space<vmem>>) attributes {dimension_semantics = [], scalar_prefetch = 0 : i64, scratch_operands = 0 : i64, tpu.core_type = #tpu.core_type<tc>} {
    %c0 = arith.constant 0 : index
    %c0_0 = arith.constant 0 : index
    %0 = vector.load %arg0[%c0, %c0_0] : memref<10x16xf32, #tpu.memory_space<vmem>>, vector<10x16xf32>
    %c0_1 = arith.constant 0 : index
    %c0_2 = arith.constant 0 : index
    %1 = vector.load %arg1[%c0_1, %c0_2] : memref<10x16xf32, #tpu.memory_space<vmem>>, vector<10x16xf32>
    %cst = arith.constant dense<0xFF800000> : vector<16xf32>
    %2 = vector.multi_reduction <maximumf>, %0, %cst [0] : vector<10x16xf32> to vector<16xf32>
    %3 = vector.shape_cast %2 : vector<16xf32> to vector<1x16xf32>
    %4 = vector.broadcast %3 : vector<1x16xf32> to vector<10x16xf32>
    %5 = arith.subf %0, %4 : vector<10x16xf32>
    %6 = math.exp %5 : vector<10x16xf32>
    %cst_3 = arith.constant dense<0.000000e+00> : vector<16xf32>
    %7 = vector.multi_reduction <add>, %6, %cst_3 [0] : vector<10x16xf32> to vector<16xf32>
    %8 = vector.shape_cast %7 : vector<16xf32> to vector<1x16xf32>
    %cst_4 = arith.constant 1.000000e+00 : f32
    %9 = vector.broadcast %cst_4 : f32 to vector<1x16xf32>
    %10 = arith.divf %9, %8 : vector<1x16xf32>
    %cst_5 = arith.constant 2.000000e-01 : f32
    %11 = vector.broadcast %cst_5 : f32 to vector<1x16xf32>
    %12 = arith.cmpf ogt, %10, %11 : vector<1x16xf32>
    %13 = arith.extui %12 : vector<1x16xi1> to vector<1x16xi32>
    %14 = arith.sitofp %13 : vector<1x16xi32> to vector<1x16xf32>
    %15 = vector.shape_cast %14 : vector<1x16xf32> to vector<1x1x16xf32>
    %cst_6 = arith.constant dense<0.000000e+00> : vector<1xf32>
    %16 = vector.multi_reduction <add>, %15, %cst_6 [1, 2] : vector<1x1x16xf32> to vector<1xf32>
    %17 = vector.shape_cast %16 : vector<1xf32> to vector<1x1x1xf32>
    %18 = vector.extract %17[0, 0, 0] : f32 from vector<1x1x1xf32>
    %19 = vector.broadcast %18 : f32 to vector<1x1xf32>
    %20 = tpu.iota {dimensions = array<i32: 0>} : vector<10x16xi32>
    %21 = vector.broadcast %3 : vector<1x16xf32> to vector<10x16xf32>
    %22 = arith.cmpf oeq, %0, %21 : vector<10x16xf32>
    %c10_i32 = arith.constant 10 : i32
    %23 = vector.broadcast %c10_i32 : i32 to vector<10x16xi32>
    %24 = arith.select %22, %20, %23 : vector<10x16xi1>, vector<10x16xi32>
    %cst_7 = arith.constant dense<2147483647> : vector<16xi32>
    %25 = vector.multi_reduction <minsi>, %24, %cst_7 [0] : vector<10x16xi32> to vector<16xi32>
    %26 = vector.shape_cast %25 : vector<16xi32> to vector<1x16xi32>
    %27 = vector.broadcast %26 : vector<1x16xi32> to vector<10x16xi32>
    %28 = arith.cmpi eq, %20, %27 : vector<10x16xi32>
    %29 = arith.extui %28 : vector<10x16xi1> to vector<10x16xi32>
    %30 = arith.sitofp %29 : vector<10x16xi32> to vector<10x16xf32>
    %cst_8 = arith.constant dense<0xFF800000> : vector<16xf32>
    %31 = vector.multi_reduction <maximumf>, %1, %cst_8 [0] : vector<10x16xf32> to vector<16xf32>
    %32 = vector.shape_cast %31 : vector<16xf32> to vector<1x16xf32>
    %33 = vector.broadcast %32 : vector<1x16xf32> to vector<10x16xf32>
    %34 = arith.subf %1, %33 : vector<10x16xf32>
    %35 = math.exp %34 : vector<10x16xf32>
    %cst_9 = arith.constant dense<0.000000e+00> : vector<16xf32>
    %36 = vector.multi_reduction <add>, %35, %cst_9 [0] : vector<10x16xf32> to vector<16xf32>
    %37 = vector.shape_cast %36 : vector<16xf32> to vector<1x16xf32>
    %38 = math.log %37 : vector<1x16xf32>
    %39 = arith.mulf %30, %1 : vector<10x16xf32>
    %cst_10 = arith.constant dense<0.000000e+00> : vector<16xf32>
    %40 = vector.multi_reduction <add>, %39, %cst_10 [0] : vector<10x16xf32> to vector<16xf32>
    %41 = vector.shape_cast %40 : vector<16xf32> to vector<1x16xf32>
    %42 = arith.subf %41, %32 : vector<1x16xf32>
    %43 = arith.subf %38, %42 : vector<1x16xf32>
    %44 = vector.broadcast %14 : vector<1x16xf32> to vector<10x16xf32>
    %45 = arith.mulf %30, %44 : vector<10x16xf32>
    %cst_11 = arith.constant dense<0.000000e+00> : vector<10xf32>
    %46 = vector.multi_reduction <add>, %45, %cst_11 [1] : vector<10x16xf32> to vector<10xf32>
    %47 = vector.shape_cast %46 : vector<10xf32> to vector<10x1xf32>
    %cst_12 = arith.constant 0.000000e+00 : f32
    %48 = vector.broadcast %cst_12 : f32 to vector<10x1xf32>
    %49 = arith.cmpf ogt, %47, %48 : vector<10x1xf32>
    %50 = vector.broadcast %19 : vector<1x1xf32> to vector<10x1xf32>
    %51 = arith.divf %50, %47 : vector<10x1xf32>
    %cst_13 = arith.constant 1.000000e+00 : f32
    %52 = vector.broadcast %cst_13 : f32 to vector<10x1xf32>
    %53 = arith.select %49, %51, %52 : vector<10x1xi1>, vector<10x1xf32>
    %54 = vector.broadcast %53 : vector<10x1xf32> to vector<10x16xf32>
    %55 = arith.mulf %30, %54 : vector<10x16xf32>
    %cst_14 = arith.constant dense<0.000000e+00> : vector<16xf32>
    %56 = vector.multi_reduction <add>, %55, %cst_14 [0] : vector<10x16xf32> to vector<16xf32>
    %57 = vector.shape_cast %56 : vector<16xf32> to vector<1x16xf32>
    %58 = arith.mulf %14, %57 : vector<1x16xf32>
    %59 = arith.mulf %58, %43 : vector<1x16xf32>
    %60 = vector.shape_cast %59 : vector<1x16xf32> to vector<1x1x16xf32>
    %cst_15 = arith.constant dense<0.000000e+00> : vector<1xf32>
    %61 = vector.multi_reduction <add>, %60, %cst_15 [1, 2] : vector<1x1x16xf32> to vector<1xf32>
    %62 = vector.shape_cast %61 : vector<1xf32> to vector<1x1x1xf32>
    %63 = vector.extract %62[0, 0, 0] : f32 from vector<1x1x1xf32>
    %64 = vector.broadcast %63 : f32 to vector<1x1xf32>
    %65 = vector.shape_cast %58 : vector<1x16xf32> to vector<1x1x16xf32>
    %cst_16 = arith.constant dense<0.000000e+00> : vector<1xf32>
    %66 = vector.multi_reduction <add>, %65, %cst_16 [1, 2] : vector<1x1x16xf32> to vector<1xf32>
    %67 = vector.shape_cast %66 : vector<1xf32> to vector<1x1x1xf32>
    %68 = vector.extract %67[0, 0, 0] : f32 from vector<1x1x1xf32>
    %69 = vector.broadcast %68 : f32 to vector<1x1xf32>
    %cst_17 = arith.constant 0.000000e+00 : f32
    %70 = vector.broadcast %cst_17 : f32 to vector<1x1xf32>
    %71 = arith.cmpf ogt, %69, %70 : vector<1x1xf32>
    %cst_18 = arith.constant 1.000000e+00 : f32
    %72 = vector.broadcast %cst_18 : f32 to vector<1x1xf32>
    %73 = arith.select %71, %69, %72 : vector<1x1xi1>, vector<1x1xf32>
    %74 = arith.divf %64, %73 : vector<1x1xf32>
    %cst_19 = arith.constant 0.000000e+00 : f32
    %75 = vector.broadcast %cst_19 : f32 to vector<1x1xf32>
    %76 = arith.select %71, %74, %75 : vector<1x1xi1>, vector<1x1xf32>
    %77 = tpu.iota {dimensions = array<i32: 0>} : vector<8x16xi32>
    %c0_i32 = arith.constant 0 : i32
    %78 = vector.broadcast %c0_i32 : i32 to vector<8x16xi32>
    %79 = arith.cmpi eq, %77, %78 : vector<8x16xi32>
    %80 = arith.sitofp %26 : vector<1x16xi32> to vector<1x16xf32>
    %cst_20 = arith.constant 0.000000e+00 : f32
    %81 = vector.shape_cast %80 : vector<1x16xf32> to vector<1x16xf32>
    %82 = vector.broadcast %81 : vector<1x16xf32> to vector<8x16xf32>
    %83 = vector.broadcast %cst_20 : f32 to vector<8x16xf32>
    %84 = arith.select %79, %82, %83 : vector<8x16xi1>, vector<8x16xf32>
    %c1_i32 = arith.constant 1 : i32
    %85 = vector.broadcast %c1_i32 : i32 to vector<8x16xi32>
    %86 = arith.cmpi eq, %77, %85 : vector<8x16xi32>
    %87 = vector.shape_cast %14 : vector<1x16xf32> to vector<1x16xf32>
    %88 = vector.broadcast %87 : vector<1x16xf32> to vector<8x16xf32>
    %89 = arith.select %86, %88, %84 : vector<8x16xi1>, vector<8x16xf32>
    %c2_i32 = arith.constant 2 : i32
    %90 = vector.broadcast %c2_i32 : i32 to vector<8x16xi32>
    %91 = arith.cmpi eq, %77, %90 : vector<8x16xi32>
    %92 = vector.shape_cast %76 : vector<1x1xf32> to vector<1x1xf32>
    %93 = vector.broadcast %92 : vector<1x1xf32> to vector<8x16xf32>
    %94 = arith.select %91, %93, %89 : vector<8x16xi1>, vector<8x16xf32>
    %c3_i32 = arith.constant 3 : i32
    %95 = vector.broadcast %c3_i32 : i32 to vector<8x16xi32>
    %96 = arith.cmpi eq, %77, %95 : vector<8x16xi32>
    %97 = vector.shape_cast %19 : vector<1x1xf32> to vector<1x1xf32>
    %98 = vector.broadcast %97 : vector<1x1xf32> to vector<8x16xf32>
    %99 = arith.select %96, %98, %94 : vector<8x16xi1>, vector<8x16xf32>
    %c0_21 = arith.constant 0 : index
    %c0_22 = arith.constant 0 : index
    %100 = vector.load %arg2[%c0_21, %c0_22] : memref<8x16xf32, #tpu.memory_space<vmem>>, vector<8x16xf32>
    tpu.vector_store %arg2[%c0_21, %c0_22], %99 {strides = array<i32>} : memref<8x16xf32, #tpu.memory_space<vmem>>, vector<8x16xf32>,
    return
  }
}

</mosaic_0001>

<bundles_post_ra>
// kernel: confidence_based_ce_pallas.1
= control target key start
LH: loop header
LB: loop body
LE: loop exit
PB: predicated region body
PF: predicated region fallthrough
CT: control target
= control target key end

     0   :  { %vm15_vm0 = vcmask 130048   ;;  %vm17_vm1 = vcmask 123904   ;;  %v57_v6 = vlaneseq  ;;  %vm46_vm10 = vcmask 122880   ;;  %s316_s0 = inlined_call_operand.vmem [shape: f32[10,16], index: 0, kind: input, shape index: {}]   ;;  %s317_s1 = inlined_call_operand.vmem [shape: f32[10,16], index: 1, kind: input, shape index: {}]   ;;  %s318_s2 = inlined_call_operand.vmem [shape: f32[8,16], index: 2, kind: output, shape index: {}]  }
   0x1   :  { %v11_v0 = vld [vmem:[%s316_s0] sm:$0xff]  ;;  %v12_v1 = vld [vmem:[%s316_s0 + $0x8] sm:$0x3]  ;;  %v221_v41 = vmov 0.0  }
   0x2   :  { %v16_v2 = vsel %vm15_vm0, %v11_v0, -inf  ;;  %v18_v3 = vsel %vm17_vm1, %v12_v1, -inf  ;;  %v245_v9 = vshrl.u32 %v57_v6, 7  ;;  %v14_v50 = vld [vmem:[%s317_s1 + $0x8] sm:$0x3]  ;;  %v13_v51 = vld [vmem:[%s317_s1] sm:$0xff] }
   0x3   :  { %v19_v4 = vmax.f32 %v16_v2, %v18_v3  ;;  %v84_v52 = vsel %vm17_vm1, %v14_v50, -inf  ;;  %v83_v53 = vsel %vm15_vm0, %v13_v51, -inf }
   0x4   :  { %v59_v12 = vadd.s32 8, %v245_v9  ;;  %v85_v54 = vmax.f32 %v83_v53, %v84_v52  ;;  %vm179_vm15 = vcmp.eq.s32.totalorder %v245_v9, 0 }
   0x5   :  { %v20_v5 = vrot.slane %v19_v4, 4 }
   0x6   :  { %v86_v55 = vrot.slane %v85_v54, 4 }
   0x7   :  { %v21_v7 = vmax.f32 %v19_v4, %v20_v5 }
   0x8   :  { %v87_v56 = vmax.f32 %v85_v54, %v86_v55 }
   0x9   :  { %v22_v8 = vrot.slane %v21_v7, 2 }
   0xa   :  { %v88_v57 = vrot.slane %v87_v56, 2 }
   0xb   :  { %v23_v10 = vmax.f32 %v21_v7, %v22_v8 }
   0xc   :  { %v89_v58 = vmax.f32 %v87_v56, %v88_v57 }
   0xd   :  { %v24_v11 = vrot.slane %v23_v10, 1 }
   0xe   :  { %v90_v62 = vrot.slane %v89_v58, 1 }
   0xf   :  { %v25_v13 = vmax.f32 %v23_v10, %v24_v11 }
  0x11   :  { %v26_v14 = vsub.f32 %v11_v0, %v25_v13  ;;  %v27_v15 = vsub.f32 %v12_v1, %v25_v13  ;;  %vm60_vm2 = vcmp.eq.f32.partialorder %v11_v0, %v25_v13  ;;  %vm61_vm3 = vcmp.eq.f32.partialorder %v12_v1, %v25_v13 }
  0x12   :  { %v62_v16 = vsel %vm60_vm2, %v245_v9, 10  ;;  %v63_v17 = vsel %vm61_vm3, %v59_v12, 10  ;;  %v91_v1 = vmax.f32 %v89_v58, %v90_v62  ;;  %vm184_vm2 = vcmp.eq.s32.totalorder %v245_v9, 2 }
  0x13   :  { %v28_v18 = vmul.f32 1.442695, %v26_v14  ;;  %v30_v19 = vmul.f32 1.442695, %v27_v15  ;;  %v64_v20 = vsel %vm15_vm0, %v62_v16, 2147483647 }
  0x14   :  { %v65_v21 = vsel %vm17_vm1, %v63_v17, 2147483647  ;;  %v92_v4 = vsub.f32 %v13_v51, %v91_v1  ;;  %v93_v5 = vsub.f32 %v14_v50, %v91_v1  ;;  %vm186_vm3 = vcmp.eq.s32.totalorder %v245_v9, 3 }
  0x15   :  { %203 = vpow2.f32 %v28_v18  ;;  %vm66_vm4 = vcmp.lt.s32.totalorder %v64_v20, %v65_v21 }
  0x16   :  { %205 = vpow2.f32 %v30_v19  ;;  %v67_v22 = vsel %vm66_vm4, %v64_v20, %v65_v21  ;;  %v94_v6 = vmul.f32 1.442695, %v92_v4  ;;  %v96_v7 = vmul.f32 1.442695, %v93_v5 }
  0x17   :  { %v68_v23 = vrot.slane %v67_v22, 4 }
  0x19   :  { %vm69_vm5 = vcmp.lt.s32.totalorder %v67_v22, %v68_v23 }
  0x1a   :  { %v70_v27 = vsel %vm69_vm5, %v67_v22, %v68_v23 }
  0x1b   :  { %v71_v30 = vrot.slane %v70_v27, 2 }
  0x1d   :  { %vm72_vm6 = vcmp.lt.s32.totalorder %v70_v27, %v71_v30 }
  0x1e   :  { %v73_v35 = vsel %vm72_vm6, %v70_v27, %v71_v30 }
  0x1f   :  { %v204_v24 = vpop.eup %203  ;;  %v74_v37 = vrot.slane %v73_v35, 1 }
  0x20   :  { %v206_v25 = vpop.eup %205  ;;  %v32_v26 = vsel %vm15_vm0, %v204_v24, 0.0 }
  0x21   :  { %v33_v28 = vsel %vm17_vm1, %v206_v25, 0.0  ;;  %vm75_vm7 = vcmp.lt.s32.totalorder %v73_v35, %v74_v37 }
  0x22   :  { %v34_v29 = vadd.f32 %v33_v28, %v32_v26  ;;  %v253_v39 = vsel %vm75_vm7, %v73_v35, %v74_v37 }
  0x23   :  { %vm78_vm8 = vcmp.eq.s32.totalorder %v59_v12, %v253_v39  ;;  %vm77_vm9 = vcmp.eq.s32.totalorder %v245_v9, %v253_v39 }
  0x24   :  { %v35_v31 = vrot.slane %v34_v29, 4  ;;  %v258_v42 = vsel %vm78_vm8, 1.0, %v221_v41  ;;  %v260_v43 = vsel %vm77_vm9, 1.0, %v221_v41 }
  0x25   :  { %v110_v15 = vmul.f32 %v258_v42, %v14_v50  ;;  %v109_v16 = vmul.f32 %v260_v43, %v13_v51 }
  0x26   :  { %v36_v32 = vadd.f32 %v35_v31, %v34_v29 }
  0x27   :  { %v112_v18 = vsel %vm17_vm1, %v110_v15, 0.0  ;;  %v111_v19 = vsel %vm15_vm0, %v109_v16, 0.0  ;;  %v180_v15 = vcvt.s32.f32 %v253_v39 }
  0x28   :  { %v37_v33 = vrot.slane %v36_v32, 2  ;;  %v113_v23 = vadd.f32 %v112_v18, %v111_v19 }
  0x29   :  { %v181_v16 = vsel %vm179_vm15, %v180_v15, 0.0 }
  0x2a   :  { %v38_v34 = vadd.f32 %v37_v33, %v36_v32  ;;  %v114_v25 = vrot.slane %v113_v23, 4 }
  0x2c   :  { %v39_v36 = vrot.slane %v38_v34, 1  ;;  %v115_v27 = vadd.f32 %v114_v25, %v113_v23 }
  0x2e   :  { %v40_v38 = vadd.f32 %v39_v36, %v38_v34  ;;  %v116_v31 = vrot.slane %v115_v27, 2 }
  0x30   :  { %207 = vrcp.f32 %v40_v38  ;;  %v117_v37 = vadd.f32 %v116_v31, %v115_v27 }
  0x31   :  { %209 = vpow2.f32 %v94_v6 }
  0x32   :  { %211 = vpow2.f32 %v96_v7 }
  0x3a   :  { %v208_v40 = vpop.eup %207 }
  0x3b   :  { %vm43_vm11 = vcmp.gt.f32.partialorder %v208_v40, 0.2  ;;  %v210_v8 = vpop.eup %209 }
  0x3c   :  { %v262_v44 = vsel %vm43_vm11, 1.0, %v221_v41  ;;  %v212_v10 = vpop.eup %211  ;;  %v98_v11 = vsel %vm15_vm0, %v210_v8, 0.0 }
  0x3d   :  { %v47_v45 = vsel %vm46_vm10, %v262_v44, 0.0  ;;  %v123_v46 = vmul.f32 %v258_v42, %v262_v44  ;;  %v122_v47 = vmul.f32 %v260_v43, %v262_v44  ;;  %v99_v12 = vsel %vm17_vm1, %v212_v10, 0.0 }
  0x3e   :  { %48 = vadd.xlane.f32.xlu0 %v47_v45  ;;  %v100_v13 = vadd.f32 %v99_v12, %v98_v11 }
  0x3f   :  { %v127_v48 = vsel %vm17_vm1, %v123_v46, 0.0  ;;  %v124_v49 = vsel %vm15_vm0, %v122_v47, 0.0  ;;  %v118_v47 = vrot.slane %v117_v37, 1 }
  0x40   :  { %128 = vadd.xlane.f32.xlu1 %v127_v48  ;;  %v101_v14 = vrot.slane %v100_v13, 4 }
  0x41   :  { %v119_v50 = vadd.f32 %v118_v47, %v117_v37 }
  0x42   :  { %125 = vadd.xlane.f32.xlu0 %v124_v49  ;;  %v102_v17 = vadd.f32 %v101_v14, %v100_v13 }
  0x43   :  { %v120_v55 = vsub.f32 %v119_v50, %v91_v1 }
  0x44   :  { %v103_v22 = vrot.slane %v102_v17, 2 }
  0x46   :  { %v104_v24 = vadd.f32 %v103_v22, %v102_v17 }
  0x48   :  { %v105_v26 = vrot.slane %v104_v24, 1 }
  0x4a   :  { %v106_v30 = vadd.f32 %v105_v26, %v104_v24 }
  0xcb   :  { %v49_v59 = vpop.xlane.xlu0 %48 }
  0xcc   :  { %v50_v60 = vrot.slane %v49_v59, 4 }
  0xcd   :  { %v129_v20 = vpop.xlane.xlu1 %128 }
  0xce   :  { %v51_v61 = vadd.f32 %v50_v60, %v49_v59  ;;  %213 = vrcp.f32 %v129_v20  ;;  %vm131_vm12 = vcmp.gt.f32.partialorder %v129_v20, 0.0 }
  0xcf   :  { %v126_v21 = vpop.xlane.xlu0 %125 }
  0xd0   :  { %v52_v63 = vrot.slane %v51_v61, 2  ;;  %215 = vrcp.f32 %v126_v21  ;;  %vm130_vm13 = vcmp.gt.f32.partialorder %v126_v21, 0.0 }
  0xd1   :  { %217 = vlog2.f32 %v106_v30 }
  0xd2   :  { %v53_v0 = vadd.f32 %v52_v63, %v51_v61 }
  0xd4   :  { %v54_v2 = vrot.slane %v53_v0, 1 }
  0xd6   :  { %v55_v3 = vadd.f32 %v54_v2, %v53_v0 }
  0xd8   :  { %196 = vpush %v55_v3  ;;  %v214_v28 = vpop.eup %213 }
  0xda   :  { %v216_v29 = vpop.eup %215 }
  0xdb   :  { %v218_v51 = vpop.eup %217 }
  0xdc   :  { %v108_v54 = vmul.f32 0.6931472, %v218_v51 }
  0xde   :  { %v121_v58 = vsub.f32 %v108_v54, %v120_v55 }
 0x109   :  { %s197_s1 = spop %196 }
 0x10a   :  { %v286_v32 = vstv %s197_s1 }
 0x10b   :  { %v134_v33 = vmul.f32 %v216_v29, %v286_v32  ;;  %v136_v34 = vmul.f32 %v214_v28, %v286_v32 }
 0x10d   :  { %v137_v35 = vsel %vm130_vm13, %v134_v33, 1.0  ;;  %v138_v36 = vsel %vm131_vm12, %v136_v34, 1.0 }
 0x10e   :  { %v139_v38 = vmul.f32 %v260_v43, %v137_v35  ;;  %v140_v40 = vmul.f32 %v258_v42, %v138_v36 }
 0x110   :  { %v141_v41 = vsel %vm15_vm0, %v139_v38, 0.0  ;;  %v142_v45 = vsel %vm17_vm1, %v140_v40, 0.0  ;;  %vm182_vm1 = vcmp.eq.s32.totalorder %v245_v9, 1 }
 0x111   :  { %v143_v46 = vadd.f32 %v142_v45, %v141_v41  ;;  %v183_v20 = vsel %vm182_vm1, %v262_v44, %v181_v16 }
 0x113   :  { %v144_v48 = vrot.slane %v143_v46, 4 }
 0x115   :  { %v145_v49 = vadd.f32 %v144_v48, %v143_v46 }
 0x117   :  { %v146_v52 = vrot.slane %v145_v49, 2 }
 0x119   :  { %v147_v53 = vadd.f32 %v146_v52, %v145_v49 }
 0x11b   :  { %v148_v56 = vrot.slane %v147_v53, 1 }
 0x11d   :  { %v149_v57 = vadd.f32 %v148_v56, %v147_v53 }
 0x11f   :  { %v150_v43 = vmul.f32 %v262_v44, %v149_v57 }
 0x121   :  { %v163_v42 = vsel %vm46_vm10, %v150_v43, 0.0  ;;  %v151_v59 = vmul.f32 %v150_v43, %v121_v58 }
 0x122   :  { %164 = vadd.xlane.f32.xlu0 %v163_v42 }
 0x123   :  { %v152_v60 = vsel %vm46_vm10, %v151_v59, 0.0 }
 0x124   :  { %153 = vadd.xlane.f32.xlu1 %v152_v60 }
 0x1af   :  { %v165_v61 = vpop.xlane.xlu0 %164 }
 0x1b0   :  { %v166_v62 = vrot.slane %v165_v61, 4 }
 0x1b1   :  { %v154_v63 = vpop.xlane.xlu1 %153 }
 0x1b2   :  { %v167_v0 = vadd.f32 %v166_v62, %v165_v61  ;;  %v155_v2 = vrot.slane %v154_v63, 4 }
 0x1b4   :  { %v168_v3 = vrot.slane %v167_v0, 2  ;;  %v156_v4 = vadd.f32 %v155_v2, %v154_v63 }
 0x1b6   :  { %v169_v1 = vadd.f32 %v168_v3, %v167_v0  ;;  %v157_v5 = vrot.slane %v156_v4, 2 }
 0x1b8   :  { %v158_v6 = vadd.f32 %v157_v5, %v156_v4  ;;  %v170_v7 = vrot.slane %v169_v1, 1 }
 0x1ba   :  { %v159_v8 = vrot.slane %v158_v6, 1  ;;  %v171_v11 = vadd.f32 %v170_v7, %v169_v1 }
 0x1bc   :  { %v160_v10 = vadd.f32 %v159_v8, %v158_v6 }
 0x1be   :  { %198 = vpush %v160_v10 }
 0x1bf   :  { %200 = vpush %v171_v11 }
 0x1ef   :  { %s199_s16 = spop %198 }
 0x1f0   :  { %s201_s17 = spop %200  ;;  %v162_v18 = vstv %s199_s16 }
 0x1f1   :  { %v173_v12 = vstv %s201_s17 }
 0x1f2   :  { %vm297_vm14 = vcmp.gt.f32.partialorder %v173_v12, 0.0 }
 0x1f3   :  { %v175_v14 = vsel %vm297_vm14, %v173_v12, 1.0 }
 0x1f4   :  { %219 = vrcp.f32 %v175_v14 }
 0x1fe   :  { %v220_v17 = vpop.eup %219 }
 0x1ff   :  { %v177_v19 = vmul.f32 %v220_v17, %v162_v18 }
 0x201   :  { %v178_v21 = vsel %vm297_vm14, %v177_v19, 0.0 }
 0x202   :  { %v185_v22 = vsel %vm184_vm2, %v178_v21, %v183_v20 }
 0x203   :  { %v187_v39 = vsel %vm186_vm3, %v286_v32, %v185_v22 }
 0x204   :  { %188 = vst.msk [vmem:[%s318_s2] sm:$0xff] %vm15_vm0, %v187_v39 }

</bundles_post_ra>
